<compile_context>
chip_gen: v7x
topology: tpu7x:2x2x1
jax: 0.10.0
libtpu: 0.0.40
codegen_flags: <defaults>
</compile_context>

<pallas_src>
import functools

import numpy as np
import jax
import jax.numpy as jnp
from jax.experimental import pallas as pl
from jax.experimental.pallas import tpu as pltpu


_BIAS_ROWS = 8  # sublane-aligned all-ones block used to fold biases into the matmuls


# ---------------------------------------------------------------------------
# Kernel: one batch-group per grid step, lane-dense (C_pad, nb*H*W) layout,
# two fused MXU matmuls per step.
# ---------------------------------------------------------------------------
def _gcb_kernel(x_ref, w1_ref, w2_ref, hmask_ref, wmask_ref, out_ref,
                *, KH, KW, W, C_out_pad, compute_dtype):
    L = x_ref.shape[-1]
    ph = (KH - 1) // 2
    pw = (KW - 1) // 2
    f32 = jnp.float32

    ones = jnp.ones((_BIAS_ROWS, L), f32)

    def shift(v, d):
        # y[:, l] = v[:, l + d]; wrap-around positions are exactly the masked-out ones.
        if d == 0:
            return v
        return pltpu.roll(v, shift=(-d) % L, axis=1)

    def h_pieces(v):
        # taps of the (KH, 1) conv, tap-major; masks zero rows outside the image.
        return [shift(v, (t - ph) * W) * hmask_ref[t].reshape(1, L) for t in range(KH)]

    def w_pieces(v):
        # taps of the (1, KW) conv; masks zero columns outside the image row.
        return [shift(v, t - pw) * wmask_ref[t].reshape(1, L) for t in range(KW)]

    x = x_ref[...].astype(f32)                                     # (C_in_pad, L)

    # ---- stage 1: conv_l1 (h) and conv_r1 (w) fused into ONE matmul (block-diag weight),
    #      biases folded via the ones block. ----
    slab1 = jnp.concatenate(h_pieces(x) + w_pieces(x) + [ones], axis=0)
    y1 = jnp.dot(w1_ref[...], slab1.astype(compute_dtype),
                 preferred_element_type=f32)                       # (2*C_out_pad, L)
    y_l = y1[:C_out_pad]                                           # conv_l1(x) + bl1
    y_r = y1[C_out_pad:]                                           # conv_r1(x) + br1

    # ---- stage 2: conv_l2 (w) + conv_r2 (h) + path sum + bias, ONE matmul. ----
    slab2 = jnp.concatenate(w_pieces(y_l) + h_pieces(y_r) + [ones], axis=0)
    out = jnp.dot(w2_ref[...], slab2.astype(compute_dtype),
                  preferred_element_type=f32)                      # (C_out_pad, L)
    out_ref[...] = out.astype(out_ref.dtype)                       # single lane-dense store


# ---------------------------------------------------------------------------
# Wrapper
# ---------------------------------------------------------------------------
def global_conv_block(x, params, compute_dtype=jnp.float32):
    # compute_dtype=jnp.bfloat16 is the right default once C or H*W grows (MXU bf16-native);
    # keep f32 at toy shapes / tight tolerances.
    wl1, bl1, wl2, bl2, wr1, br1, wr2, br2 = params                # PyTorch OIHW weights
    N, C_in, H, W = x.shape
    C_out, _, KH, _ = wl1.shape
    KW = wl2.shape[3]
    assert KH % 2 == 1 and KW % 2 == 1, "even kernel sizes give non-integral PyTorch padding"
    ph, pw = (KH - 1) // 2, (KW - 1) // 2
    P = H * W
    f32 = jnp.float32

    rup8 = lambda c: -(-c // 8) * 8
    C_in_pad, C_out_pad = rup8(C_in), rup8(C_out)

    # Grid / batch folding: fold images onto the lane axis. Two "parallel" steps keep both
    # v7x TensorCores busy; on single-TC v5e/v6e two fat steps is ~0.7us of fixed overhead.
    n_steps = 2 if (N >= 2 and N % 2 == 0) else 1
    nb = N // n_steps
    L = nb * P

    # ---- weight prep (once, outside the kernel): tap-major flatten with channel
    #      zero-padding, fused block weights, biases folded as one weight column. ----
    def flat_taps(w3, cin):
        # w3: (C_out, cin, K) -> (C_out_pad, K*cin_pad) with col t*cin_pad+i == w3[o, i, t]
        cin_pad = rup8(cin)
        K = w3.shape[2]
        w = jnp.transpose(w3, (0, 2, 1)).astype(f32)               # (C_out, K, cin)
        w = jnp.pad(w, ((0, C_out_pad - C_out), (0, 0), (0, cin_pad - cin)))
        return w.reshape(C_out_pad, K * cin_pad)

    wl1_f = flat_taps(wl1[:, :, :, 0], C_in)                       # (C_out_pad, KH*C_in_pad)
    wr1_f = flat_taps(wr1[:, :, 0, :], C_in)                       # (C_out_pad, KW*C_in_pad)
    wl2_f = flat_taps(wl2[:, :, 0, :], C_out)                      # (C_out_pad, KW*C_out_pad)
    wr2_f = flat_taps(wr2[:, :, :, 0], C_out)                      # (C_out_pad, KH*C_out_pad)

    padb = lambda b: jnp.pad(b.astype(f32), (0, C_out_pad - C_out))

    rows_h1, rows_w1 = KH * C_in_pad, KW * C_in_pad
    slab1_rows = rows_h1 + rows_w1 + _BIAS_ROWS
    W1 = jnp.zeros((2 * C_out_pad, slab1_rows), f32)
    W1 = W1.at[:C_out_pad, :rows_h1].set(wl1_f)
    W1 = W1.at[C_out_pad:, rows_h1:rows_h1 + rows_w1].set(wr1_f)
    W1 = W1.at[:C_out_pad, rows_h1 + rows_w1].set(padb(bl1))       # pairs with ones row 0
    W1 = W1.at[C_out_pad:, rows_h1 + rows_w1].set(padb(br1))

    rows_w2, rows_h2 = KW * C_out_pad, KH * C_out_pad
    slab2_rows = rows_w2 + rows_h2 + _BIAS_ROWS
    W2 = jnp.zeros((C_out_pad, slab2_rows), f32)
    W2 = W2.at[:, :rows_w2].set(wl2_f)
    W2 = W2.at[:, rows_w2:rows_w2 + rows_h2].set(wr2_f)
    W2 = W2.at[:, rows_w2 + rows_h2].set(padb(bl2 + br2))

    W1 = W1.astype(compute_dtype)
    W2 = W2.astype(compute_dtype)

    # ---- static per-tap validity masks (host-side numpy; no in-kernel iota / mod).
    #      Valid because each image's full H*W plane lives contiguously on the lane axis.
    pos = np.arange(P, dtype=np.int64)
    hmask_img = np.stack(
        [((pos + (t - ph) * W >= 0) & (pos + (t - ph) * W < P)) for t in range(KH)]
    ).astype(np.float32)                                            # (KH, P)
    wcol = pos % W
    wmask_img = np.stack(
        [((wcol + (t - pw) >= 0) & (wcol + (t - pw) < W)) for t in range(KW)]
    ).astype(np.float32)                                            # (KW, P)
    hmask = jnp.asarray(np.tile(hmask_img, (1, nb)).reshape(KH, 1, L))
    wmask = jnp.asarray(np.tile(wmask_img, (1, nb)).reshape(KW, 1, L))

    # ---- lane-dense, batch-folded activation layout: (n_steps, C_in_pad, nb*H*W) ----
    x_p = jnp.pad(x.reshape(N, C_in, P), ((0, 0), (0, C_in_pad - C_in), (0, 0)))
    x_blk = (x_p.reshape(n_steps, nb, C_in_pad, P)
             .transpose(0, 2, 1, 3)
             .reshape(n_steps, C_in_pad, L))

    xmap = lambda g: (g, 0, 0)
    const2 = lambda g: (0, 0)
    const3 = lambda g: (0, 0, 0)

    in_specs = [
        pl.BlockSpec((pl.Squeezed(), C_in_pad, L), xmap),
        pl.BlockSpec(W1.shape, const2),
        pl.BlockSpec(W2.shape, const2),
        pl.BlockSpec((KH, 1, L), const3),
        pl.BlockSpec((KW, 1, L), const3),
    ]
    out_spec = pl.BlockSpec((pl.Squeezed(), C_out_pad, L), xmap)

    kernel = functools.partial(_gcb_kernel, KH=KH, KW=KW, W=W,
                               C_out_pad=C_out_pad, compute_dtype=compute_dtype)

    # TODO(synk): at production shapes on v7x (64 MiB VMEM / 32 MiB scoped default), tile H
    # in row-blocks with a +/-ph halo and re-derive the per-tile masks (roll+mask is only
    # valid while the whole plane lives in one block).
    out_blk = pl.pallas_call(
        kernel,
        out_shape=jax.ShapeDtypeStruct((n_steps, C_out_pad, L), x.dtype),
        grid_spec=pltpu.PrefetchScalarGridSpec(
            num_scalar_prefetch=0,
            grid=(n_steps,),
            in_specs=in_specs,
            out_specs=out_spec),
        compiler_params=pltpu.CompilerParams(
            dimension_semantics=("parallel",)),
    )(x_blk, W1, W2, hmask, wmask)

    out = (out_blk.reshape(n_steps, C_out_pad, nb, P)
           .transpose(0, 2, 1, 3)
           .reshape(N, C_out_pad, H, W))
    return out[:, :C_out]


# ---------------------------------------------------------------------------
# Deterministic parameter init (matches the nn.Conv2d init loop in __init__):
#   weight ~ N(0, sqrt(2 / (kh * kw * out_channels))), bias = 0.
# ---------------------------------------------------------------------------
def init_params(key, in_dim, out_dim, kernel_size):
    kh, kw = kernel_size
    ks = jax.random.split(key, 4)

    def w(k, shape):
        n = shape[2] * shape[3] * shape[0]
        return jax.random.normal(k, shape, jnp.float32) * jnp.sqrt(2.0 / n)

    wl1 = w(ks[0], (out_dim, in_dim, kh, 1))
    wl2 = w(ks[1], (out_dim, out_dim, 1, kw))
    wr1 = w(ks[2], (out_dim, in_dim, 1, kw))
    wr2 = w(ks[3], (out_dim, out_dim, kh, 1))
    zb = jnp.zeros((out_dim,), jnp.float32)
    return wl1, zb, wl2, zb, wr1, zb, wr2, zb


# Pure-JAX reference (lax conv) for the correctness check.
def ref_forward(x, params):
    wl1, bl1, wl2, bl2, wr1, br1, wr2, br2 = params
    KH = wl1.shape[2]
    KW = wl2.shape[3]
    ph = (KH - 1) // 2
    pw = (KW - 1) // 2

    def conv(x, w, b, pad):
        y = jax.lax.conv_general_dilated(
            x, w, window_strides=(1, 1), padding=pad,
            dimension_numbers=('NCHW', 'OIHW', 'NCHW'))
        return y + b[None, :, None, None]

    x_l = conv(x, wl1, bl1, [(ph, ph), (0, 0)])
    x_l = conv(x_l, wl2, bl2, [(0, 0), (pw, pw)])
    x_r = conv(x, wr1, br1, [(0, 0), (pw, pw)])
    x_r = conv(x_r, wr2, br2, [(ph, ph), (0, 0)])
    return x_l + x_r


if __name__ == "__main__":
    N, C_in, C_out, H, W = 2, 4, 4, 16, 16
    kernel_size = (7, 7)   # odd, so PyTorch's (k-1)/2 padding is integral

    key = jax.random.PRNGKey(0)
    kx, kp, kb = jax.random.split(key, 3)
    x = jax.random.normal(kx, (N, C_in, H, W), jnp.float32)

    params = list(init_params(kp, C_in, C_out, kernel_size))
    # nn.Conv2d init zeroes biases; use small non-zero biases here so the fused-bias
    # (ones-row) path in the kernel is actually exercised (ref uses the same params).
    for slot, bkey in zip((1, 3, 5, 7), jax.random.split(kb, 4)):
        params[slot] = 0.1 * jax.random.normal(bkey, (C_out,), jnp.float32)
    params = tuple(params)

    out = jax.block_until_ready(global_conv_block(x, params))
    ref = jax.block_until_ready(ref_forward(x, params))

    assert out.shape == (N, C_out, H, W)
    err = jnp.max(jnp.abs(out - ref))
    assert jnp.allclose(out, ref, atol=1e-3, rtol=1e-3), f"max abs err = {err}"

    print("KERNEL_OK")
</pallas_src>

<mosaic_0001>
module attributes {stable_mosaic.version = 11 : i64} {
  func.func @_gcb_kernel(%arg0: i32, %arg1: memref<1x8x256xf32, #tpu.memory_space<vmem>>, %arg2: memref<16x120xf32, #tpu.memory_space<vmem>>, %arg3: memref<8x120xf32, #tpu.memory_space<vmem>>, %arg4: memref<7x1x256xf32, #tpu.memory_space<vmem>>, %arg5: memref<7x1x256xf32, #tpu.memory_space<vmem>>, %arg6: memref<1x8x256xf32, #tpu.memory_space<vmem>>) attributes {dimension_semantics = [#tpu.dimension_semantics<parallel>], iteration_bounds = array<i64: 2>, scalar_prefetch = 0 : i64, scratch_operands = 0 : i64, tpu.core_type = #tpu.core_type<tc>, window_params = [{transform_indices = @transform_0, window_bounds = array<i64: 1, 8, 256>}, {pipeline_mode = #tpu.pipeline_mode<synchronous>, transform_indices = @transform_1, window_bounds = array<i64: 16, 120>}, {pipeline_mode = #tpu.pipeline_mode<synchronous>, transform_indices = @transform_2, window_bounds = array<i64: 8, 120>}, {pipeline_mode = #tpu.pipeline_mode<synchronous>, transform_indices = @transform_3, window_bounds = array<i64: 7, 1, 256>}, {pipeline_mode = #tpu.pipeline_mode<synchronous>, transform_indices = @transform_4, window_bounds = array<i64: 7, 1, 256>}, {transform_indices = @transform_5, window_bounds = array<i64: 1, 8, 256>}]} {
    %cst = arith.constant 1.000000e+00 : f32
    %0 = vector.broadcast %cst : f32 to vector<8x256xf32>
    %c0 = arith.constant 0 : index
    %c0_0 = arith.constant 0 : index
    %c0_1 = arith.constant 0 : index
    %1 = vector.load %arg1[%c0, %c0_0, %c0_1] : memref<1x8x256xf32, #tpu.memory_space<vmem>>, vector<1x8x256xf32>
    %2 = vector.shape_cast %1 : vector<1x8x256xf32> to vector<8x256xf32>
    %c48_i32 = arith.constant 48 : i32
    %3 = tpu.dynamic_rotate %2 by %c48_i32 dim 1 : vector<8x256xf32>, i32 -> vector<8x256xf32>
    %c0_2 = arith.constant 0 : index
    %c0_3 = arith.constant 0 : index
    %c0_4 = arith.constant 0 : index
    %4 = vector.load %arg4[%c0_2, %c0_3, %c0_4] : memref<7x1x256xf32, #tpu.memory_space<vmem>>, vector<1x1x256xf32>
    %5 = vector.shape_cast %4 : vector<1x1x256xf32> to vector<1x256xf32>
    %6 = vector.broadcast %5 : vector<1x256xf32> to vector<8x256xf32>
    %7 = arith.mulf %3, %6 : vector<8x256xf32>
    %c32_i32 = arith.constant 32 : i32
    %8 = tpu.dynamic_rotate %2 by %c32_i32 dim 1 : vector<8x256xf32>, i32 -> vector<8x256xf32>
    %c1 = arith.constant 1 : index
    %c0_5 = arith.constant 0 : index
    %c0_6 = arith.constant 0 : index
    %9 = vector.load %arg4[%c1, %c0_5, %c0_6] : memref<7x1x256xf32, #tpu.memory_space<vmem>>, vector<1x1x256xf32>
    %10 = vector.shape_cast %9 : vector<1x1x256xf32> to vector<1x256xf32>
    %11 = vector.broadcast %10 : vector<1x256xf32> to vector<8x256xf32>
    %12 = arith.mulf %8, %11 : vector<8x256xf32>
    %c16_i32 = arith.constant 16 : i32
    %13 = tpu.dynamic_rotate %2 by %c16_i32 dim 1 : vector<8x256xf32>, i32 -> vector<8x256xf32>
    %c2 = arith.constant 2 : index
    %c0_7 = arith.constant 0 : index
    %c0_8 = arith.constant 0 : index
    %14 = vector.load %arg4[%c2, %c0_7, %c0_8] : memref<7x1x256xf32, #tpu.memory_space<vmem>>, vector<1x1x256xf32>
    %15 = vector.shape_cast %14 : vector<1x1x256xf32> to vector<1x256xf32>
    %16 = vector.broadcast %15 : vector<1x256xf32> to vector<8x256xf32>
    %17 = arith.mulf %13, %16 : vector<8x256xf32>
    %c3 = arith.constant 3 : index
    %c0_9 = arith.constant 0 : index
    %c0_10 = arith.constant 0 : index
    %18 = vector.load %arg4[%c3, %c0_9, %c0_10] : memref<7x1x256xf32, #tpu.memory_space<vmem>>, vector<1x1x256xf32>
    %19 = vector.shape_cast %18 : vector<1x1x256xf32> to vector<1x256xf32>
    %20 = vector.broadcast %19 : vector<1x256xf32> to vector<8x256xf32>
    %21 = arith.mulf %2, %20 : vector<8x256xf32>
    %c240_i32 = arith.constant 240 : i32
    %22 = tpu.dynamic_rotate %2 by %c240_i32 dim 1 : vector<8x256xf32>, i32 -> vector<8x256xf32>
    %c4 = arith.constant 4 : index
    %c0_11 = arith.constant 0 : index
    %c0_12 = arith.constant 0 : index
    %23 = vector.load %arg4[%c4, %c0_11, %c0_12] : memref<7x1x256xf32, #tpu.memory_space<vmem>>, vector<1x1x256xf32>
    %24 = vector.shape_cast %23 : vector<1x1x256xf32> to vector<1x256xf32>
    %25 = vector.broadcast %24 : vector<1x256xf32> to vector<8x256xf32>
    %26 = arith.mulf %22, %25 : vector<8x256xf32>
    %c224_i32 = arith.constant 224 : i32
    %27 = tpu.dynamic_rotate %2 by %c224_i32 dim 1 : vector<8x256xf32>, i32 -> vector<8x256xf32>
    %c5 = arith.constant 5 : index
    %c0_13 = arith.constant 0 : index
    %c0_14 = arith.constant 0 : index
    %28 = vector.load %arg4[%c5, %c0_13, %c0_14] : memref<7x1x256xf32, #tpu.memory_space<vmem>>, vector<1x1x256xf32>
    %29 = vector.shape_cast %28 : vector<1x1x256xf32> to vector<1x256xf32>
    %30 = vector.broadcast %29 : vector<1x256xf32> to vector<8x256xf32>
    %31 = arith.mulf %27, %30 : vector<8x256xf32>
    %c208_i32 = arith.constant 208 : i32
    %32 = tpu.dynamic_rotate %2 by %c208_i32 dim 1 : vector<8x256xf32>, i32 -> vector<8x256xf32>
    %c6 = arith.constant 6 : index
    %c0_15 = arith.constant 0 : index
    %c0_16 = arith.constant 0 : index
    %33 = vector.load %arg4[%c6, %c0_15, %c0_16] : memref<7x1x256xf32, #tpu.memory_space<vmem>>, vector<1x1x256xf32>
    %34 = vector.shape_cast %33 : vector<1x1x256xf32> to vector<1x256xf32>
    %35 = vector.broadcast %34 : vector<1x256xf32> to vector<8x256xf32>
    %36 = arith.mulf %32, %35 : vector<8x256xf32>
    %c3_i32 = arith.constant 3 : i32
    %37 = tpu.dynamic_rotate %2 by %c3_i32 dim 1 : vector<8x256xf32>, i32 -> vector<8x256xf32>
    %c0_17 = arith.constant 0 : index
    %c0_18 = arith.constant 0 : index
    %c0_19 = arith.constant 0 : index
    %38 = vector.load %arg5[%c0_17, %c0_18, %c0_19] : memref<7x1x256xf32, #tpu.memory_space<vmem>>, vector<1x1x256xf32>
    %39 = vector.shape_cast %38 : vector<1x1x256xf32> to vector<1x256xf32>
    %40 = vector.broadcast %39 : vector<1x256xf32> to vector<8x256xf32>
    %41 = arith.mulf %37, %40 : vector<8x256xf32>
    %c2_i32 = arith.constant 2 : i32
    %42 = tpu.dynamic_rotate %2 by %c2_i32 dim 1 : vector<8x256xf32>, i32 -> vector<8x256xf32>
    %c1_20 = arith.constant 1 : index
    %c0_21 = arith.constant 0 : index
    %c0_22 = arith.constant 0 : index
    %43 = vector.load %arg5[%c1_20, %c0_21, %c0_22] : memref<7x1x256xf32, #tpu.memory_space<vmem>>, vector<1x1x256xf32>
    %44 = vector.shape_cast %43 : vector<1x1x256xf32> to vector<1x256xf32>
    %45 = vector.broadcast %44 : vector<1x256xf32> to vector<8x256xf32>
    %46 = arith.mulf %42, %45 : vector<8x256xf32>
    %c1_i32 = arith.constant 1 : i32
    %47 = tpu.dynamic_rotate %2 by %c1_i32 dim 1 : vector<8x256xf32>, i32 -> vector<8x256xf32>
    %c2_23 = arith.constant 2 : index
    %c0_24 = arith.constant 0 : index
    %c0_25 = arith.constant 0 : index
    %48 = vector.load %arg5[%c2_23, %c0_24, %c0_25] : memref<7x1x256xf32, #tpu.memory_space<vmem>>, vector<1x1x256xf32>
    %49 = vector.shape_cast %48 : vector<1x1x256xf32> to vector<1x256xf32>
    %50 = vector.broadcast %49 : vector<1x256xf32> to vector<8x256xf32>
    %51 = arith.mulf %47, %50 : vector<8x256xf32>
    %c3_26 = arith.constant 3 : index
    %c0_27 = arith.constant 0 : index
    %c0_28 = arith.constant 0 : index
    %52 = vector.load %arg5[%c3_26, %c0_27, %c0_28] : memref<7x1x256xf32, #tpu.memory_space<vmem>>, vector<1x1x256xf32>
    %53 = vector.shape_cast %52 : vector<1x1x256xf32> to vector<1x256xf32>
    %54 = vector.broadcast %53 : vector<1x256xf32> to vector<8x256xf32>
    %55 = arith.mulf %2, %54 : vector<8x256xf32>
    %c255_i32 = arith.constant 255 : i32
    %56 = tpu.dynamic_rotate %2 by %c255_i32 dim 1 : vector<8x256xf32>, i32 -> vector<8x256xf32>
    %c4_29 = arith.constant 4 : index
    %c0_30 = arith.constant 0 : index
    %c0_31 = arith.constant 0 : index
    %57 = vector.load %arg5[%c4_29, %c0_30, %c0_31] : memref<7x1x256xf32, #tpu.memory_space<vmem>>, vector<1x1x256xf32>
    %58 = vector.shape_cast %57 : vector<1x1x256xf32> to vector<1x256xf32>
    %59 = vector.broadcast %58 : vector<1x256xf32> to vector<8x256xf32>
    %60 = arith.mulf %56, %59 : vector<8x256xf32>
    %c254_i32 = arith.constant 254 : i32
    %61 = tpu.dynamic_rotate %2 by %c254_i32 dim 1 : vector<8x256xf32>, i32 -> vector<8x256xf32>
    %c5_32 = arith.constant 5 : index
    %c0_33 = arith.constant 0 : index
    %c0_34 = arith.constant 0 : index
    %62 = vector.load %arg5[%c5_32, %c0_33, %c0_34] : memref<7x1x256xf32, #tpu.memory_space<vmem>>, vector<1x1x256xf32>
    %63 = vector.shape_cast %62 : vector<1x1x256xf32> to vector<1x256xf32>
    %64 = vector.broadcast %63 : vector<1x256xf32> to vector<8x256xf32>
    %65 = arith.mulf %61, %64 : vector<8x256xf32>
    %c253_i32 = arith.constant 253 : i32
    %66 = tpu.dynamic_rotate %2 by %c253_i32 dim 1 : vector<8x256xf32>, i32 -> vector<8x256xf32>
    %c6_35 = arith.constant 6 : index
    %c0_36 = arith.constant 0 : index
    %c0_37 = arith.constant 0 : index
    %67 = vector.load %arg5[%c6_35, %c0_36, %c0_37] : memref<7x1x256xf32, #tpu.memory_space<vmem>>, vector<1x1x256xf32>
    %68 = vector.shape_cast %67 : vector<1x1x256xf32> to vector<1x256xf32>
    %69 = vector.broadcast %68 : vector<1x256xf32> to vector<8x256xf32>
    %70 = arith.mulf %66, %69 : vector<8x256xf32>
    %71 = tpu.concatenate %7, %12, %17, %21, %26, %31, %36, %41, %46, %51, %55, %60, %65, %70, %0 in 0 : vector<8x256xf32>, vector<8x256xf32>, vector<8x256xf32>, vector<8x256xf32>, vector<8x256xf32>, vector<8x256xf32>, vector<8x256xf32>, vector<8x256xf32>, vector<8x256xf32>, vector<8x256xf32>, vector<8x256xf32>, vector<8x256xf32>, vector<8x256xf32>, vector<8x256xf32>, vector<8x256xf32> -> vector<120x256xf32>
    %c0_38 = arith.constant 0 : index
    %c0_39 = arith.constant 0 : index
    %72 = vector.load %arg2[%c0_38, %c0_39] : memref<16x120xf32, #tpu.memory_space<vmem>>, vector<16x120xf32>
    %cst_40 = arith.constant dense<0.000000e+00> : vector<16x256xf32>
    %73 = tpu.matmul %72, %71, %cst_40 {dimension_numbers = #tpu.dot_dimension_numbers<[1], [0], [0], [1], [0, 0, 1, 1], [], []>} : vector<16x120xf32>, vector<120x256xf32>, vector<16x256xf32> -> vector<16x256xf32>
    %74 = vector.extract_strided_slice %73 {offsets = [0, 0], sizes = [8, 256], strides = [1, 1]} : vector<16x256xf32> to vector<8x256xf32>
    %75 = vector.extract_strided_slice %73 {offsets = [8, 0], sizes = [8, 256], strides = [1, 1]} : vector<16x256xf32> to vector<8x256xf32>
    %c3_i32_41 = arith.constant 3 : i32
    %76 = tpu.dynamic_rotate %74 by %c3_i32_41 dim 1 : vector<8x256xf32>, i32 -> vector<8x256xf32>
    %c0_42 = arith.constant 0 : index
    %c0_43 = arith.constant 0 : index
    %c0_44 = arith.constant 0 : index
    %77 = vector.load %arg5[%c0_42, %c0_43, %c0_44] : memref<7x1x256xf32, #tpu.memory_space<vmem>>, vector<1x1x256xf32>
    %78 = vector.shape_cast %77 : vector<1x1x256xf32> to vector<1x256xf32>
    %79 = vector.broadcast %78 : vector<1x256xf32> to vector<8x256xf32>
    %80 = arith.mulf %76, %79 : vector<8x256xf32>
    %c2_i32_45 = arith.constant 2 : i32
    %81 = tpu.dynamic_rotate %74 by %c2_i32_45 dim 1 : vector<8x256xf32>, i32 -> vector<8x256xf32>
    %c1_46 = arith.constant 1 : index
    %c0_47 = arith.constant 0 : index
    %c0_48 = arith.constant 0 : index
    %82 = vector.load %arg5[%c1_46, %c0_47, %c0_48] : memref<7x1x256xf32, #tpu.memory_space<vmem>>, vector<1x1x256xf32>
    %83 = vector.shape_cast %82 : vector<1x1x256xf32> to vector<1x256xf32>
    %84 = vector.broadcast %83 : vector<1x256xf32> to vector<8x256xf32>
    %85 = arith.mulf %81, %84 : vector<8x256xf32>
    %c1_i32_49 = arith.constant 1 : i32
    %86 = tpu.dynamic_rotate %74 by %c1_i32_49 dim 1 : vector<8x256xf32>, i32 -> vector<8x256xf32>
    %c2_50 = arith.constant 2 : index
    %c0_51 = arith.constant 0 : index
    %c0_52 = arith.constant 0 : index
    %87 = vector.load %arg5[%c2_50, %c0_51, %c0_52] : memref<7x1x256xf32, #tpu.memory_space<vmem>>, vector<1x1x256xf32>
    %88 = vector.shape_cast %87 : vector<1x1x256xf32> to vector<1x256xf32>
    %89 = vector.broadcast %88 : vector<1x256xf32> to vector<8x256xf32>
    %90 = arith.mulf %86, %89 : vector<8x256xf32>
    %c3_53 = arith.constant 3 : index
    %c0_54 = arith.constant 0 : index
    %c0_55 = arith.constant 0 : index
    %91 = vector.load %arg5[%c3_53, %c0_54, %c0_55] : memref<7x1x256xf32, #tpu.memory_space<vmem>>, vector<1x1x256xf32>
    %92 = vector.shape_cast %91 : vector<1x1x256xf32> to vector<1x256xf32>
    %93 = vector.broadcast %92 : vector<1x256xf32> to vector<8x256xf32>
    %94 = arith.mulf %74, %93 : vector<8x256xf32>
    %c255_i32_56 = arith.constant 255 : i32
    %95 = tpu.dynamic_rotate %74 by %c255_i32_56 dim 1 : vector<8x256xf32>, i32 -> vector<8x256xf32>
    %c4_57 = arith.constant 4 : index
    %c0_58 = arith.constant 0 : index
    %c0_59 = arith.constant 0 : index
    %96 = vector.load %arg5[%c4_57, %c0_58, %c0_59] : memref<7x1x256xf32, #tpu.memory_space<vmem>>, vector<1x1x256xf32>
    %97 = vector.shape_cast %96 : vector<1x1x256xf32> to vector<1x256xf32>
    %98 = vector.broadcast %97 : vector<1x256xf32> to vector<8x256xf32>
    %99 = arith.mulf %95, %98 : vector<8x256xf32>
    %c254_i32_60 = arith.constant 254 : i32
    %100 = tpu.dynamic_rotate %74 by %c254_i32_60 dim 1 : vector<8x256xf32>, i32 -> vector<8x256xf32>
    %c5_61 = arith.constant 5 : index
    %c0_62 = arith.constant 0 : index
    %c0_63 = arith.constant 0 : index
    %101 = vector.load %arg5[%c5_61, %c0_62, %c0_63] : memref<7x1x256xf32, #tpu.memory_space<vmem>>, vector<1x1x256xf32>
    %102 = vector.shape_cast %101 : vector<1x1x256xf32> to vector<1x256xf32>
    %103 = vector.broadcast %102 : vector<1x256xf32> to vector<8x256xf32>
    %104 = arith.mulf %100, %103 : vector<8x256xf32>
    %c253_i32_64 = arith.constant 253 : i32
    %105 = tpu.dynamic_rotate %74 by %c253_i32_64 dim 1 : vector<8x256xf32>, i32 -> vector<8x256xf32>
    %c6_65 = arith.constant 6 : index
    %c0_66 = arith.constant 0 : index
    %c0_67 = arith.constant 0 : index
    %106 = vector.load %arg5[%c6_65, %c0_66, %c0_67] : memref<7x1x256xf32, #tpu.memory_space<vmem>>, vector<1x1x256xf32>
    %107 = vector.shape_cast %106 : vector<1x1x256xf32> to vector<1x256xf32>
    %108 = vector.broadcast %107 : vector<1x256xf32> to vector<8x256xf32>
    %109 = arith.mulf %105, %108 : vector<8x256xf32>
    %c48_i32_68 = arith.constant 48 : i32
    %110 = tpu.dynamic_rotate %75 by %c48_i32_68 dim 1 : vector<8x256xf32>, i32 -> vector<8x256xf32>
    %c0_69 = arith.constant 0 : index
    %c0_70 = arith.constant 0 : index
    %c0_71 = arith.constant 0 : index
    %111 = vector.load %arg4[%c0_69, %c0_70, %c0_71] : memref<7x1x256xf32, #tpu.memory_space<vmem>>, vector<1x1x256xf32>
    %112 = vector.shape_cast %111 : vector<1x1x256xf32> to vector<1x256xf32>
    %113 = vector.broadcast %112 : vector<1x256xf32> to vector<8x256xf32>
    %114 = arith.mulf %110, %113 : vector<8x256xf32>
    %c32_i32_72 = arith.constant 32 : i32
    %115 = tpu.dynamic_rotate %75 by %c32_i32_72 dim 1 : vector<8x256xf32>, i32 -> vector<8x256xf32>
    %c1_73 = arith.constant 1 : index
    %c0_74 = arith.constant 0 : index
    %c0_75 = arith.constant 0 : index
    %116 = vector.load %arg4[%c1_73, %c0_74, %c0_75] : memref<7x1x256xf32, #tpu.memory_space<vmem>>, vector<1x1x256xf32>
    %117 = vector.shape_cast %116 : vector<1x1x256xf32> to vector<1x256xf32>
    %118 = vector.broadcast %117 : vector<1x256xf32> to vector<8x256xf32>
    %119 = arith.mulf %115, %118 : vector<8x256xf32>
    %c16_i32_76 = arith.constant 16 : i32
    %120 = tpu.dynamic_rotate %75 by %c16_i32_76 dim 1 : vector<8x256xf32>, i32 -> vector<8x256xf32>
    %c2_77 = arith.constant 2 : index
    %c0_78 = arith.constant 0 : index
    %c0_79 = arith.constant 0 : index
    %121 = vector.load %arg4[%c2_77, %c0_78, %c0_79] : memref<7x1x256xf32, #tpu.memory_space<vmem>>, vector<1x1x256xf32>
    %122 = vector.shape_cast %121 : vector<1x1x256xf32> to vector<1x256xf32>
    %123 = vector.broadcast %122 : vector<1x256xf32> to vector<8x256xf32>
    %124 = arith.mulf %120, %123 : vector<8x256xf32>
    %c3_80 = arith.constant 3 : index
    %c0_81 = arith.constant 0 : index
    %c0_82 = arith.constant 0 : index
    %125 = vector.load %arg4[%c3_80, %c0_81, %c0_82] : memref<7x1x256xf32, #tpu.memory_space<vmem>>, vector<1x1x256xf32>
    %126 = vector.shape_cast %125 : vector<1x1x256xf32> to vector<1x256xf32>
    %127 = vector.broadcast %126 : vector<1x256xf32> to vector<8x256xf32>
    %128 = arith.mulf %75, %127 : vector<8x256xf32>
    %c240_i32_83 = arith.constant 240 : i32
    %129 = tpu.dynamic_rotate %75 by %c240_i32_83 dim 1 : vector<8x256xf32>, i32 -> vector<8x256xf32>
    %c4_84 = arith.constant 4 : index
    %c0_85 = arith.constant 0 : index
    %c0_86 = arith.constant 0 : index
    %130 = vector.load %arg4[%c4_84, %c0_85, %c0_86] : memref<7x1x256xf32, #tpu.memory_space<vmem>>, vector<1x1x256xf32>
    %131 = vector.shape_cast %130 : vector<1x1x256xf32> to vector<1x256xf32>
    %132 = vector.broadcast %131 : vector<1x256xf32> to vector<8x256xf32>
    %133 = arith.mulf %129, %132 : vector<8x256xf32>
    %c224_i32_87 = arith.constant 224 : i32
    %134 = tpu.dynamic_rotate %75 by %c224_i32_87 dim 1 : vector<8x256xf32>, i32 -> vector<8x256xf32>
    %c5_88 = arith.constant 5 : index
    %c0_89 = arith.constant 0 : index
    %c0_90 = arith.constant 0 : index
    %135 = vector.load %arg4[%c5_88, %c0_89, %c0_90] : memref<7x1x256xf32, #tpu.memory_space<vmem>>, vector<1x1x256xf32>
    %136 = vector.shape_cast %135 : vector<1x1x256xf32> to vector<1x256xf32>
    %137 = vector.broadcast %136 : vector<1x256xf32> to vector<8x256xf32>
    %138 = arith.mulf %134, %137 : vector<8x256xf32>
    %c208_i32_91 = arith.constant 208 : i32
    %139 = tpu.dynamic_rotate %75 by %c208_i32_91 dim 1 : vector<8x256xf32>, i32 -> vector<8x256xf32>
    %c6_92 = arith.constant 6 : index
    %c0_93 = arith.constant 0 : index
    %c0_94 = arith.constant 0 : index
    %140 = vector.load %arg4[%c6_92, %c0_93, %c0_94] : memref<7x1x256xf32, #tpu.memory_space<vmem>>, vector<1x1x256xf32>
    %141 = vector.shape_cast %140 : vector<1x1x256xf32> to vector<1x256xf32>
    %142 = vector.broadcast %141 : vector<1x256xf32> to vector<8x256xf32>
    %143 = arith.mulf %139, %142 : vector<8x256xf32>
    %144 = tpu.concatenate %80, %85, %90, %94, %99, %104, %109, %114, %119, %124, %128, %133, %138, %143, %0 in 0 : vector<8x256xf32>, vector<8x256xf32>, vector<8x256xf32>, vector<8x256xf32>, vector<8x256xf32>, vector<8x256xf32>, vector<8x256xf32>, vector<8x256xf32>, vector<8x256xf32>, vector<8x256xf32>, vector<8x256xf32>, vector<8x256xf32>, vector<8x256xf32>, vector<8x256xf32>, vector<8x256xf32> -> vector<120x256xf32>
    %c0_95 = arith.constant 0 : index
    %c0_96 = arith.constant 0 : index
    %145 = vector.load %arg3[%c0_95, %c0_96] : memref<8x120xf32, #tpu.memory_space<vmem>>, vector<8x120xf32>
    %cst_97 = arith.constant dense<0.000000e+00> : vector<8x256xf32>
    %146 = tpu.matmul %145, %144, %cst_97 {dimension_numbers = #tpu.dot_dimension_numbers<[1], [0], [0], [1], [0, 0, 1, 1], [], []>} : vector<8x120xf32>, vector<120x256xf32>, vector<8x256xf32> -> vector<8x256xf32>
    %c0_98 = arith.constant 0 : index
    %c0_99 = arith.constant 0 : index
    %c0_100 = arith.constant 0 : index
    %147 = vector.load %arg6[%c0_98, %c0_99, %c0_100] : memref<1x8x256xf32, #tpu.memory_space<vmem>>, vector<1x8x256xf32>
    %148 = vector.shape_cast %147 : vector<1x8x256xf32> to vector<8x256xf32>
    %149 = vector.shape_cast %146 : vector<8x256xf32> to vector<1x8x256xf32>
    tpu.vector_store %arg6[%c0_98, %c0_99, %c0_100], %149 {strides = array<i32>} : memref<1x8x256xf32, #tpu.memory_space<vmem>>, vector<1x8x256xf32>,
    return
  }
  func.func @transform_0(%arg0: i32) -> (i32, i32, i32) {
    %c0_i32 = arith.constant 0 : i32
    %c0_i32_0 = arith.constant 0 : i32
    %c0_i32_1 = arith.constant 0 : i32
    return %arg0, %c0_i32, %c0_i32_0 : i32, i32, i32
  }
  func.func @transform_1(%arg0: i32) -> (i32, i32) {
    %c0_i32 = arith.constant 0 : i32
    %c0_i32_0 = arith.constant 0 : i32
    %c0_i32_1 = arith.constant 0 : i32
    return %c0_i32, %c0_i32_0 : i32, i32
  }
  func.func @transform_2(%arg0: i32) -> (i32, i32) {
    %c0_i32 = arith.constant 0 : i32
    %c0_i32_0 = arith.constant 0 : i32
    %c0_i32_1 = arith.constant 0 : i32
    return %c0_i32, %c0_i32_0 : i32, i32
  }
  func.func @transform_3(%arg0: i32) -> (i32, i32, i32) {
    %c0_i32 = arith.constant 0 : i32
    %c0_i32_0 = arith.constant 0 : i32
    %c0_i32_1 = arith.constant 0 : i32
    %c0_i32_2 = arith.constant 0 : i32
    return %c0_i32, %c0_i32_0, %c0_i32_1 : i32, i32, i32
  }
  func.func @transform_4(%arg0: i32) -> (i32, i32, i32) {
    %c0_i32 = arith.constant 0 : i32
    %c0_i32_0 = arith.constant 0 : i32
    %c0_i32_1 = arith.constant 0 : i32
    %c0_i32_2 = arith.constant 0 : i32
    return %c0_i32, %c0_i32_0, %c0_i32_1 : i32, i32, i32
  }
  func.func @transform_5(%arg0: i32) -> (i32, i32, i32) {
    %c0_i32 = arith.constant 0 : i32
    %c0_i32_0 = arith.constant 0 : i32
    %c0_i32_1 = arith.constant 0 : i32
    return %arg0, %c0_i32, %c0_i32_0 : i32, i32, i32
  }
}

</mosaic_0001>

<bundles_post_ra>
// kernel: tpu_custom_call.1
= control target key start
LH: loop header
LB: loop body
LE: loop exit
PB: predicated region body
PF: predicated region fallthrough
CT: control target
= control target key end

     0   :  { %10 = vsyncpa [#allocation3], 0  ;;  %s2022_s0 = inlined_call_operand.hbm [shape: f32[2,8,256], index: 0, kind: input, shape index: {}]   ;;  %s2023_s1 = inlined_call_operand.hbm [shape: f32[16,120], index: 1, kind: input, shape index: {}]   ;;  %s2024_s2 = inlined_call_operand.hbm [shape: f32[8,120], index: 2, kind: input, shape index: {}]   ;;  %s2025_s3 = inlined_call_operand.hbm [shape: f32[7,1,256], index: 3, kind: input, shape index: {}]   ;;  %s2026_s4 = inlined_call_operand.vmem [shape: f32[7,1,256], index: 4, kind: input, shape index: {}]   ;;  %s2027_s5 = inlined_call_operand.hbm [shape: f32[2,8,256], index: 5, kind: output, shape index: {}]  }
   0x1   :  { %12 = vsyncpa [#allocation3 + $0x1], 0 }
   0x2   :  { %13 = vsyncpa [#allocation6], 0 }
   0x3   :  { %14 = vsyncpa [#allocation9], 0 }
   0x4   :  { %15 = vsyncpa [#allocation4], 0 }
   0x5   :  { %17 = vsyncpa [#allocation4 + $0x1], 0  ;;  %s1381_s18 = smov 0   ;;  %s1383_s19 = smov 0  }
   0x6   :  { %s1385_s20 = smov 0   ;;  %s1387_s21 = smov 0  }
   0x7 LB: > { %s1402_s22 = sadd.s32 4294967295, %s1326_s21   ;;  %s956_s23 = sadd.s32 4294967294, %s1326_s21   ;;  %s1326_s21 = sphi %s1387_s21, %s2061_s21   ;;  %s1322_s20 = sphi %s1385_s20, %s2060_s20   ;;  %s1318_s19 = sphi %s1383_s19, %s2059_s19   ;;  %s1314_s18 = sphi %s1381_s18, %s2058_s18  }
   0x8   : > { %p43_p0 = scmp.ne.s32.totalorder %s1318_s19, %s1314_s18  ;;  %p2028_p1 = scmp.eq.s32.totalorder %s1402_s22, 0 }
   0x9   : > { %p157_p3 = scmp.eq.s32.totalorder %s956_s23, 1  ;;  %p957_p5 = scmp.ge.s32.totalorder %s1326_s21, 1 }
   0xa   : > { %p1411_p4 = por %p2028_p1, %p43_p0  ;;  %p164_p7 = scmp.lt.s32.totalorder %s1326_s21, 3 }
   0xb   : > { %p1416_p6 = por %p157_p3, %p43_p0  ;;  %s1328_s27 = smov [#allocation5]  }
   0xc   : > { %s2038_s24 = scalar_select %p1411_p4, 1, 0 }
   0xd   : > { %s2039_s25 = scalar_select %p1416_p6, 1, 0 }
   0xe   : > { %p1421_p8 = pnand %p957_p5, %p164_p7  ;;  %s176_s28 = sshll.u32 %s1328_s27, 4  ;;  %s1425_s28 = int_to_ptr.vmem [resolvable:$true] %s176_s28 }
   0xf   : > { %s1329_s30 = smov [#allocation7]   ;;  %s1330_s7 = smov [#allocation8]  }
  0x10   : > { %s2040_s26 = scalar_select %p1421_p8, 1, 0 }
  0x11   : > { %p1059_p9 = pneg %p1421_p8  ;;  %s190_s6 = sshll.u32 %s1329_s30, 4  ;;  %s1436_s6 = int_to_ptr.vmem [resolvable:$true] %s190_s6 }
  0x12   : > { %s1438_s8 = sshll.u32 %s1330_s7, 4  ;;  %s1138_s11 = scalar_lea.hbm %s2023_s1, 256  ;;  %s201_s8 = int_to_ptr.vmem [resolvable:$true] %s1438_s8 }
  0x13   : > { %p1432_p11 = pnand %p1059_p9, %p2028_p1  ;;  %p1139_p12 = scmp.ne.s32.totalorder %s2023_s1, %s1138_s11 }
  0x14   : > { %p1145_p5 = scmp.lt.u32.totalorder %s1138_s11, %s2023_s1 }
  0x15   : > { %p1448_p13 = pneg %p1432_p11 }
  0x17   : > { %p1141_p0 = pnand %p1448_p13, %p1139_p12 }
  0x19   : > { %p1142_p3 = pneg %p1141_p0 }
  0x1b   : > { %p1147_p7 = pnand %p1145_p5, %p1142_p3 }
  0x1d   : > { %1150 = shalt.err (!%p1147_p7)
}
  0x1e   : > { %s1151_s17 = scalar_lea.vmem %s1425_s28, 256  ;;  %p1159_p2 = scmp.lt.s32.totalorder %s1425_s28, %s1425_s28 }
  0x1f   : > { %p1152_p9 = scmp.ne.s32.totalorder %s1425_s28, %s1151_s17  ;;  %p1160_p6 = scmp.lt.s32.totalorder %s1151_s17, %s1151_s17 }
  0x21   : > { %p1154_p10 = pnand %p1152_p9, %p1448_p13  ;;  %p1161_p12 = por %p1160_p6, %p1159_p2 }
  0x23   : > { %p1155_p1 = pneg %p1154_p10 }
  0x25   : > { %p1162_p0 = pnand %p1161_p12, %p1155_p1 }
  0x27   : > { %1165 = shalt.err (!%p1162_p0)
}
  0x28   : > { %s1331_s23 = smov 128   ;;  %s1332_s27 = smov 8  }
  0x29   : > { %1062 = dma.hbm_to_vmem [thread:$0]  (!%p1432_p11), %s2023_s1, 256, %s1425_s28, [#allocation6], %s1331_s23, %s1331_s23, %s1332_s27  }
  0x2a   : > { %s1166_s11 = scalar_lea.hbm %s2024_s2, 128 }
  0x2b   : > { %p1167_p2 = scmp.ne.s32.totalorder %s2024_s2, %s1166_s11  ;;  %p1173_p10 = scmp.lt.u32.totalorder %s1166_s11, %s2024_s2 }
  0x2d   : > { %p1169_p1 = pnand %p1167_p2, %p1448_p13 }
  0x2f   : > { %p1170_p6 = pneg %p1169_p1 }
  0x31   : > { %p1175_p3 = pnand %p1173_p10, %p1170_p6 }
  0x33   : > { %1178 = shalt.err (!%p1175_p3)
}
  0x34   : > { %s1179_s28 = scalar_lea.vmem %s1436_s6, 128  ;;  %p1187_p12 = scmp.lt.s32.totalorder %s1436_s6, %s1436_s6 }
  0x35   : > { %p1180_p5 = scmp.ne.s32.totalorder %s1436_s6, %s1179_s28  ;;  %p1188_p0 = scmp.lt.s32.totalorder %s1179_s28, %s1179_s28 }
  0x37   : > { %p1182_p7 = pnand %p1180_p5, %p1448_p13  ;;  %p1189_p2 = por %p1188_p0, %p1187_p12 }
  0x39   : > { %p1183_p9 = pneg %p1182_p7 }
  0x3b   : > { %p1190_p1 = pnand %p1189_p2, %p1183_p9 }
  0x3d   : > { %1193 = shalt.err (!%p1190_p1)
}
  0x3e   : > { %1065 = dma.hbm_to_vmem [thread:$0]  (!%p1432_p11), %s2024_s2, 128, %s1436_s6, [#allocation6]  }
  0x3f   : > { %s1194_s7 = scalar_lea.hbm %s2025_s3, 224 }
  0x40   : > { %p1195_p6 = scmp.ne.s32.totalorder %s2025_s3, %s1194_s7  ;;  %p1201_p5 = scmp.lt.u32.totalorder %s1194_s7, %s2025_s3 }
  0x42   : > { %p1197_p10 = pnand %p1195_p6, %p1448_p13 }
  0x44   : > { %p1198_p3 = pneg %p1197_p10 }
  0x46   : > { %p1203_p7 = pnand %p1201_p5, %p1198_p3 }
  0x48   : > { %1206 = shalt.err (!%p1203_p7)
}
  0x49   : > { %s1207_s13 = scalar_lea.vmem %s201_s8, 224  ;;  %p1215_p2 = scmp.lt.s32.totalorder %s201_s8, %s201_s8 }
  0x4a   : > { %p1208_p9 = scmp.ne.s32.totalorder %s201_s8, %s1207_s13  ;;  %p1216_p1 = scmp.lt.s32.totalorder %s1207_s13, %s1207_s13 }
  0x4c   : > { %p1210_p12 = pnand %p1208_p9, %p1448_p13  ;;  %p1217_p4 = por %p1216_p1, %p1215_p2 }
  0x4e   : > { %p1211_p0 = pneg %p1210_p12 }
  0x50   : > { %p1218_p8 = pnand %p1217_p4, %p1211_p0 }
  0x52   : > { %1221 = shalt.err (!%p1218_p8)
}
  0x53   : > { %s1333_s6 = smov 32   ;;  %s1334_s14 = smov 2  }
  0x54   : > { %1068 = dma.hbm_to_vmem [thread:$0]  (!%p1432_p11), %s2025_s3, 224, %s201_s8, [#allocation9], %s1333_s6, %s1333_s6, %s1334_s14  }
  0x55   : > { %s1512_s28 = sadd.s32 1, %s1326_s21   ;;  %s30_s23 = sadd.s32 1, %s1322_s20 }
  0x56   : > { %s27_s17 = ssub.s32 %s1326_s21, %s1512_s28  ;;  %p37_p8 = scmp.ne.s32.totalorder %s1322_s20, %s1318_s19 }
  0x57   : > { %p28_p4 = scmp.eq.s32.totalorder %s27_s17, 0  ;;  %p38_p13 = scmp.eq.s32.totalorder %s1326_s21, 0 }
  0x58   : > { %p1080_p6 = scmp.lt.s32.totalorder %s1326_s21, 2  ;;  %p2043_p3 = scmp.eq.s32.totalorder %s1402_s22, 1 }
  0x59   : > { %s1522_s27 = scalar_select %p28_p4, %s1322_s20, %s30_s23  }
  0x5a   : > { %p39_p10 = por %p38_p13, %p37_p8  ;;  %p1526_p5 = por %p2043_p3, %p37_p8 }
  0x5b   : > { %s217_s29 = sand.u32 1, %s1322_s20   ;;  %s985_s7 = sshll.u32 %s1326_s21, 8 }
  0x5c   : > { %s962_s8 = sshll.u32 %s217_s29, 4  ;;  %s1535_s11 = scalar_lea.hbm %s2022_s0, %s985_s7 }
  0x5d   : > { %s221_s12 = scalar_lea.vmem [#allocation2], %s962_s8  ;;  %p1537_p11 = pnand %p1080_p6, %p39_p10 }
  0x5e   : > { %s229_s13 = sshll.u32 %s221_s12, 4  ;;  %s218_s14 = scalar_lea.sflag [#allocation3], %s217_s29  ;;  %s1541_s13 = int_to_ptr.vmem [resolvable:$true] %s229_s13 }
  0x5f   : > { %s1222_s15 = scalar_lea.hbm %s1535_s11, 256  ;;  %p1224_p9 = pneg %p1537_p11 }
  0x60   : > { %p1223_p7 = scmp.ne.s32.totalorder %s1535_s11, %s1222_s15  ;;  %s1227_s23 = scalar_lea.hbm %s2022_s0, 512 }
  0x61   : > { %p1228_p2 = scmp.lt.u32.totalorder %s1535_s11, %s2022_s0  ;;  %p1229_p1 = scmp.lt.u32.totalorder %s1227_s23, %s1222_s15 }
  0x62   : > { %p1225_p12 = pnand %p1224_p9, %p1223_p7  ;;  %p1231_p8 = scmp.lt.u32.totalorder %s1222_s15, %s1535_s11 }
  0x63   : > { %p1230_p4 = por %p1229_p1, %p1228_p2 }
  0x64   : > { %p1226_p0 = pneg %p1225_p12 }
  0x65   : > { %p1232_p13 = por %p1231_p8, %p1230_p4 }
  0x67   : > { %p1233_p6 = pnand %p1232_p13, %p1226_p0 }
  0x69   : > { %1236 = shalt.err (!%p1233_p6)
}
  0x6a   : > { %s1237_s29 = scalar_lea.vmem %s1541_s13, 256  ;;  %s1335_s9 = smov [#allocation2]  }
  0x6b   : > { %p1238_p10 = scmp.ne.s32.totalorder %s1541_s13, %s1237_s29  ;;  %s1242_s10 = sshll.u32 %s1335_s9, 4  ;;  %s1243_s10 = int_to_ptr.vmem [resolvable:$false] %s1242_s10 }
  0x6c   : > { %s1244_s12 = scalar_lea.vmem %s1243_s10, 512  ;;  %p1245_p12 = scmp.lt.s32.totalorder %s1541_s13, %s1243_s10 }
  0x6d   : > { %p1240_p3 = pnand %p1238_p10, %p1224_p9  ;;  %p1246_p2 = scmp.lt.s32.totalorder %s1244_s12, %s1237_s29 }
  0x6f   : > { %p1241_p7 = pneg %p1240_p3  ;;  %p1247_p1 = por %p1246_p2, %p1245_p12 }
  0x71   : > { %p1248_p4 = pnand %p1247_p1, %p1241_p7 }
  0x73   : > { %1251 = shalt.err (!%p1248_p4)
}
  0x74   : > { %1072 = dma.hbm_to_vmem [thread:$0]  (!%p1537_p11), %s1535_s11, 256, %s1541_s13, %s218_s14  }
  0x75   : > { %p2046_p0 = scmp.ne.s32.totalorder %s2040_s26, 0 }
  0x76   : > { %s1571_s15 = sand.u32 (!%p2046_p0), 1, %s1318_s19   ;;  %p2047_p9 = scmp.ne.s32.totalorder (!%p2046_p0), %s2038_s24, 0 }
  0x77   : > { %238 = sbr.rel (%p2046_p0) target bundleno = 915 (0x393), region = 40  ;;  %s2031_s16 = sshll.u32 (!%p2046_p0), %s1571_s15, 4 }
  0x78   : > { %s241_s17 = scalar_lea.sflag (!%p2046_p0), [#allocation3], %s1571_s15  ;;  %s244_s23 = scalar_lea.vmem (!%p2046_p0), [#allocation2], %s2031_s16 }
  0x7e   : > { %1297 = dma.done.wait (%p2047_p9), %s241_s17, 256  }
  0x7f   : > { %1299 = vsyncadd (%p2047_p9), %s241_s17, 4294967040  ;;  %p2048_p11 = scmp.eq.s32.totalorder %s1402_s22, 0 }
  0x81   : > { %1301 = dma.done.wait (%p2048_p11), [#allocation6], 384   ;;  %p2049_p8 = pmov %p2048_p11 }
  0x83   : > { %1303 = vsyncadd (%p2049_p8), [#allocation6], 4294966912  ;;  %p2050_p13 = pmov %p2049_p8 }
  0x84   : > { %p2051_p6 = pmov %p2049_p8 }
  0x85   : > { %1305 = dma.done.wait (%p2050_p13), [#allocation9], 224  }
  0x86   : > { %1307 = vsyncadd (%p2051_p6), [#allocation9], 4294967072  ;;  %v1589_v0 = vld [vmem:[%s244_s23] sm:$0xff]  ;;  %s1336_s26 = smov 32   ;;  %s1337_s24 = smov 48   ;;  %v1595_v1 = vld [vmem:[%s244_s23 + $0x8] sm:$0xff]  ;;  %v289_v3 = vlaneseq }
  0x87   : > { %308 = vrot.lane.b32.xlu1 %v1589_v0, %s1336_s26  ;;  %285 = vrot.lane.b32.xlu0 %v1589_v0, %s1337_s24  ;;  %s1338_s11 = smov 16   ;;  %s2036_s13 = smov 112   ;;  %v1347_v2 = vmov 0.0   ;;  %v316_v8 = vld [vmem:[#allocation8 + $0x2] sm:$0x3]  ;;  %vm581_vm12 = vcmask 982016  }
  0x88   : > { %s2034_s6 = smov 96   ;;  %s2032_s14 = smov 80   ;;  %652 = vmatprep.mubr.f32.mxu0 %v1347_v2  ;;  %833 = vmatprep.mubr.f32.mxu1 %v1347_v2  ;;  %v297_v4 = vshrl.u32 %v289_v3, 7  ;;  %v1643_v5 = vand.u32 127, %v289_v3  ;;  %v294_v9 = vld [vmem:[#allocation8] sm:$0x3] }
  0x89   : > { %s1342_s7 = smov 3   ;;  %s1343_s8 = smov 2   ;;  %v338_v12 = vld [vmem:[#allocation8 + $0x4] sm:$0x3]  ;;  %v353_v13 = vld [vmem:[#allocation8 + $0x6] sm:$0x3] }
  0x8a   : > { %s1344_s29 = smov 1   ;;  %s1345_s9 = smov 127   ;;  %v1645_v6 = vsub.s32 0, %v297_v4  ;;  %v1647_v7 = vsub.s32 1, %v297_v4  ;;  %vm312_vm0 = vcmp.lt.s32.totalorder %v1643_v5, 32  ;;  %vm291_vm1 = vcmp.lt.s32.totalorder %v1643_v5, 48 }
  0x8b   : > { %310 = vrot.lane.b32.xlu1 %v1595_v1, %s1336_s26  ;;  %287 = vrot.lane.b32.xlu0 %v1595_v1, %s1337_s24  ;;  %s1346_s10 = smov 126   ;;  %s1348_s12 = smov 125   ;;  %vm334_vm2 = vcmp.lt.s32.totalorder %v1643_v5, 16  ;;  %v375_v42 = vld [vmem:[#allocation8 + $0x8] sm:$0x3]  ;;  %vm371_vm3 = vcmp.lt.s32.totalorder %v1643_v5, 112 }
  0x8c   : > { %v1652_v14 = vrot.slane %v316_v8, %v1645_v6  ;;  %v1655_v15 = vrot.slane %v294_v9, %v1645_v6  ;;  %v1658_v16 = vrot.slane %v294_v9, %v1647_v7  ;;  %v1661_v17 = vrot.slane %v316_v8, %v1647_v7  ;;  %v397_v43 = vld [vmem:[#allocation8 + $0xa] sm:$0x3]  ;;  %v419_v62 = vld [vmem:[#allocation8 + $0xc] sm:$0x3]  ;;  %v440_v63 = vld [vmem:[%s2026_s4] sm:$0x3] }
  0x8d   : > { %v1665_v20 = vrot.slane %v338_v12, %v1645_v6  ;;  %v1668_v21 = vrot.slane %v338_v12, %v1647_v7  ;;  %v1671_v22 = vrot.slane %v353_v13, %v1647_v7  ;;  %v1674_v23 = vrot.slane %v353_v13, %v1645_v6 }
  0x8e   : > { %v1700_v48 = vrot.slane %v375_v42, %v1645_v6  ;;  %v1703_v49 = vrot.slane %v375_v42, %v1647_v7  ;;  %vm393_vm4 = vcmp.lt.s32.totalorder %v1643_v5, 96  ;;  %v1707_v50 = vrot.slane %v397_v43, %v1645_v6 }
  0x8f   : > { %332 = vrot.lane.b32.xlu1 %v1595_v1, %s1338_s11  ;;  %330 = vrot.lane.b32.xlu0 %v1589_v0, %s1338_s11  ;;  %v366_v36 = vmul.f32 %v1671_v22, %v1595_v1  ;;  %v365_v37 = vmul.f32 %v1674_v23, %v1589_v0  ;;  %v1710_v51 = vrot.slane %v397_v43, %v1647_v7  ;;  %vm415_vm5 = vcmp.lt.s32.totalorder %v1643_v5, 80  ;;  %v974_v43 = vld [vmem:[%s2026_s4 + $0x8] sm:$0x3] }
  0x90   : > { %vm437_vm6 = vcmp.lt.s32.totalorder %v1643_v5, 3  ;;  %v1736_v12 = vrot.slane %v440_v63, %v1645_v6  ;;  %v1739_v13 = vrot.slane %v440_v63, %v1647_v7  ;;  %vm458_vm7 = vcmp.lt.s32.totalorder %v1643_v5, 2 }
  0x91   : > { %vm480_vm8 = vcmp.lt.s32.totalorder %v1643_v5, 1  ;;  %vm517_vm9 = vcmp.lt.s32.totalorder %v1643_v5, 127  ;;  %vm539_vm10 = vcmp.lt.s32.totalorder %v1643_v5, 126  ;;  %vm561_vm11 = vcmp.lt.s32.totalorder %v1643_v5, 125 }
  0x93   : > { %369 = vrot.lane.b32.xlu1 %v1595_v1, %s2036_s13  ;;  %367 = vrot.lane.b32.xlu0 %v1589_v0, %s2036_s13 }
  0x97   : > { %391 = vrot.lane.b32.xlu1 %v1595_v1, %s2034_s6  ;;  %389 = vrot.lane.b32.xlu0 %v1589_v0, %s2034_s6 }
  0x9b   : > { %413 = vrot.lane.b32.xlu1 %v1595_v1, %s2032_s14  ;;  %411 = vrot.lane.b32.xlu0 %v1589_v0, %s2032_s14  ;;  %s843_s14 = scalar_lea.sflag [#allocation4], %s1571_s15 }
  0x9f   : > { %435 = vrot.lane.b32.xlu1 %v1595_v1, %s1342_s7  ;;  %433 = vrot.lane.b32.xlu0 %v1589_v0, %s1342_s7 }
  0xa3   : > { %456 = vrot.lane.b32.xlu1 %v1595_v1, %s1343_s8  ;;  %454 = vrot.lane.b32.xlu0 %v1589_v0, %s1343_s8 }
  0xa7   : > { %478 = vrot.lane.b32.xlu1 %v1595_v1, %s1344_s29  ;;  %476 = vrot.lane.b32.xlu0 %v1589_v0, %s1344_s29 }
  0xab   : > { %515 = vrot.lane.b32.xlu1 %v1595_v1, %s1345_s9  ;;  %513 = vrot.lane.b32.xlu0 %v1589_v0, %s1345_s9 }
  0xaf   : > { %537 = vrot.lane.b32.xlu1 %v1595_v1, %s1346_s10  ;;  %535 = vrot.lane.b32.xlu0 %v1589_v0, %s1346_s10 }
  0xb3   : > { %559 = vrot.lane.b32.xlu1 %v1595_v1, %s1348_s12  ;;  %557 = vrot.lane.b32.xlu0 %v1589_v0, %s1348_s12 }
  0xf9   : > { %v309_v10 = vpop.permute.xlu1 %308  ;;  %v286_v11 = vpop.permute.xlu0 %285 }
  0xfd   : > { %v311_v18 = vpop.permute.xlu1 %310  ;;  %v288_v19 = vpop.permute.xlu0 %287 }
  0xfe   : > { %v313_v24 = vsel %vm312_vm0, %v309_v10, %v311_v18  ;;  %v314_v25 = vsel %vm312_vm0, %v311_v18, %v309_v10  ;;  %v292_v26 = vsel %vm291_vm1, %v286_v11, %v288_v19  ;;  %v293_v27 = vsel %vm291_vm1, %v288_v19, %v286_v11 }
  0xff   : > { %v328_v28 = vmul.f32 %v1652_v14, %v314_v25  ;;  %v306_v29 = vmul.f32 %v1655_v15, %v293_v27  ;;  %v307_v30 = vmul.f32 %v1658_v16, %v292_v26  ;;  %v329_v31 = vmul.f32 %v1661_v17, %v313_v24 }
 0x100   : > { %v1729_v10 = vrot.slane %v419_v62, %v1645_v6  ;;  %v1732_v11 = vrot.slane %v419_v62, %v1647_v7 }
 0x101   : > { %v333_v32 = vpop.permute.xlu1 %332  ;;  %v331_v33 = vpop.permute.xlu0 %330  ;;  %v987_v34 = vpack.c.bf16 %v329_v31, %v307_v30  ;;  %v989_v35 = vpack.c.bf16 %v328_v28, %v306_v29 }
 0x102   : > { %v335_v38 = vsel %vm334_vm2, %v331_v33, %v333_v32  ;;  %v336_v39 = vsel %vm334_vm2, %v333_v32, %v331_v33  ;;  %v971_v32 = vld [vmem:[%s2026_s4 + $0x2] sm:$0x3]  ;;  %v972_v33 = vld [vmem:[%s2026_s4 + $0x4] sm:$0x3] }
 0x103   : > { %v350_v40 = vmul.f32 %v1665_v20, %v336_v39  ;;  %v351_v41 = vmul.f32 %v1668_v21, %v335_v38  ;;  %988 = vmatprep.subr.bf16.mxu0 %v987_v34  ;;  %v1761_v38 = vrot.slane %v971_v32, %v1645_v6  ;;  %v973_v39 = vld [vmem:[%s2026_s4 + $0x6] sm:$0x3]  ;;  %v1774_v42 = vrot.slane %v972_v33, %v1647_v7 }
 0x104   : > { %990 = vmatpush1.bf16.msra.mxu0 %v989_v35 }
 0x105   : > { %v370_v44 = vpop.permute.xlu1 %369  ;;  %v368_v45 = vpop.permute.xlu0 %367  ;;  %v991_v46 = vpack.c.bf16 %v366_v36, %v351_v41  ;;  %v993_v47 = vpack.c.bf16 %v365_v37, %v350_v40  ;;  %v1767_v40 = vrot.slane %v971_v32, %v1647_v7  ;;  %v1771_v41 = vrot.slane %v972_v33, %v1645_v6 }
 0x106   : > { %v372_v52 = vsel %vm371_vm3, %v368_v45, %v370_v44  ;;  %v373_v53 = vsel %vm371_vm3, %v370_v44, %v368_v45 }
 0x107   : > { %992 = vmatprep.subr.bf16.mxu0 %v991_v46  ;;  %v387_v58 = vmul.f32 %v1700_v48, %v372_v52  ;;  %v388_v59 = vmul.f32 %v1703_v49, %v373_v53  ;;  %v1785_v52 = vrot.slane %v973_v39, %v1647_v7  ;;  %v1788_v53 = vrot.slane %v973_v39, %v1645_v6 }
 0x108   : > { %994 = vmatpush1.bf16.msra.mxu0 %v993_v47 }
 0x109   : > { %v392_v54 = vpop.permute.xlu1 %391  ;;  %v390_v55 = vpop.permute.xlu0 %389 }
 0x10a   : > { %v394_v56 = vsel %vm393_vm4, %v390_v55, %v392_v54  ;;  %v395_v57 = vsel %vm393_vm4, %v392_v54, %v390_v55 }
 0x10b   : > { %v409_v60 = vmul.f32 %v1707_v50, %v394_v56  ;;  %v410_v61 = vmul.f32 %v1710_v51, %v395_v57  ;;  %v1795_v56 = vrot.slane %v974_v43, %v1645_v6  ;;  %v1798_v57 = vrot.slane %v974_v43, %v1647_v7 }
 0x10d   : > { %v414_v3 = vpop.permute.xlu1 %413  ;;  %v412_v4 = vpop.permute.xlu0 %411  ;;  %v995_v8 = vpack.c.bf16 %v410_v61, %v388_v59  ;;  %v997_v9 = vpack.c.bf16 %v409_v60, %v387_v58 }
 0x10e   : > { %v416_v18 = vsel %vm415_vm5, %v412_v4, %v414_v3  ;;  %v417_v19 = vsel %vm415_vm5, %v414_v3, %v412_v4 }
 0x10f   : > { %996 = vmatprep.subr.bf16.mxu0 %v995_v8  ;;  %v431_v28 = vmul.f32 %v1729_v10, %v416_v18  ;;  %v432_v29 = vmul.f32 %v1732_v11, %v417_v19  ;;  %v512_v8 = vmul.f32 %v1785_v52, %v1595_v1 }
 0x110   : > { %998 = vmatpush1.bf16.msra.mxu0 %v997_v9  ;;  %v511_v9 = vmul.f32 %v1788_v53, %v1589_v0  ;;  %v976_v0 = vld [vmem:[%s2026_s4 + $0xc] sm:$0x3] }
 0x111   : > { %v436_v24 = vpop.permute.xlu1 %435  ;;  %v434_v25 = vpop.permute.xlu0 %433  ;;  %v1829_v32 = vrot.slane %v976_v0, %v1645_v6  ;;  %v1832_v33 = vrot.slane %v976_v0, %v1647_v7 }
 0x112   : > { %v438_v26 = vsel %vm437_vm6, %v434_v25, %v436_v24  ;;  %v439_v27 = vsel %vm437_vm6, %v436_v24, %v434_v25 }
 0x113   : > { %v452_v30 = vmul.f32 %v1736_v12, %v439_v27  ;;  %v453_v31 = vmul.f32 %v1739_v13, %v438_v26  ;;  %v975_v26 = vld [vmem:[%s2026_s4 + $0xa] sm:$0x3] }
 0x115   : > { %v457_v34 = vpop.permute.xlu1 %456  ;;  %v455_v35 = vpop.permute.xlu0 %454  ;;  %v999_v36 = vpack.c.bf16 %v453_v31, %v432_v29  ;;  %v1001_v37 = vpack.c.bf16 %v452_v30, %v431_v28  ;;  %v1822_v30 = vrot.slane %v975_v26, %v1645_v6  ;;  %v1825_v31 = vrot.slane %v975_v26, %v1647_v7 }
 0x116   : > { %v459_v44 = vsel %vm458_vm7, %v455_v35, %v457_v34  ;;  %v460_v45 = vsel %vm458_vm7, %v457_v34, %v455_v35 }
 0x117   : > { %1000 = vmatprep.subr.bf16.mxu0 %v999_v36  ;;  %v474_v58 = vmul.f32 %v1761_v38, %v460_v45  ;;  %v475_v59 = vmul.f32 %v1767_v40, %v459_v44 }
 0x118   : > { %1002 = vmatpush1.bf16.msra.mxu0 %v1001_v37 }
 0x119   : > { %v479_v46 = vpop.permute.xlu1 %478  ;;  %v477_v47 = vpop.permute.xlu0 %476 }
 0x11a   : > { %v481_v54 = vsel %vm480_vm8, %v477_v47, %v479_v46  ;;  %v482_v55 = vsel %vm480_vm8, %v479_v46, %v477_v47 }
 0x11b   : > { %v496_v60 = vmul.f32 %v1771_v41, %v482_v55  ;;  %v497_v61 = vmul.f32 %v1774_v42, %v481_v54  ;;  %v1349_v54 = vmov 1.0   ;;  %v579_v55 = vld [vmem:[#allocation5] sm:$0xff] }
 0x11d   : > { %v516_v62 = vpop.permute.xlu1 %515  ;;  %v514_v63 = vpop.permute.xlu0 %513  ;;  %v1003_v3 = vpack.c.bf16 %v497_v61, %v475_v59  ;;  %v1005_v4 = vpack.c.bf16 %v496_v60, %v474_v58  ;;  %v580_v58 = vld [vmem:[#allocation5 + $0x8] sm:$0xff] }
 0x11e   : > { %v518_v18 = vsel %vm517_vm9, %v514_v63, %v516_v62  ;;  %v519_v19 = vsel %vm517_vm9, %v516_v62, %v514_v63 }
 0x11f   : > { %v533_v24 = vmul.f32 %v1795_v56, %v518_v18  ;;  %v534_v25 = vmul.f32 %v1798_v57, %v519_v19  ;;  %1004 = vmatprep.subr.bf16.mxu0 %v1003_v3 }
 0x120   : > { %1006 = vmatpush1.bf16.msra.mxu0 %v1005_v4 }
 0x121   : > { %v538_v1 = vpop.permute.xlu1 %537  ;;  %v536_v27 = vpop.permute.xlu0 %535  ;;  %v1007_v28 = vpack.c.bf16 %v534_v25, %v512_v8  ;;  %v1009_v29 = vpack.c.bf16 %v533_v24, %v511_v9 }
 0x122   : > { %v540_v34 = vsel %vm539_vm10, %v536_v27, %v538_v1  ;;  %v541_v35 = vsel %vm539_vm10, %v538_v1, %v536_v27 }
 0x123   : > { %1008 = vmatprep.subr.bf16.mxu0 %v1007_v28  ;;  %v555_v6 = vmul.f32 %v1822_v30, %v540_v34  ;;  %v556_v7 = vmul.f32 %v1825_v31, %v541_v35 }
 0x124   : > { %1010 = vmatpush1.bf16.msra.mxu0 %v1009_v29 }
 0x125   : > { %v560_v36 = vpop.permute.xlu1 %559  ;;  %v558_v37 = vpop.permute.xlu0 %557 }
 0x126   : > { %v562_v39 = vsel %vm561_vm11, %v558_v37, %v560_v36  ;;  %v563_v43 = vsel %vm561_vm11, %v560_v36, %v558_v37 }
 0x127   : > { %v577_v44 = vmul.f32 %v1829_v32, %v562_v39  ;;  %v578_v45 = vmul.f32 %v1832_v33, %v563_v43 }
 0x129   : > { %v1011_v46 = vpack.c.bf16 %v578_v45, %v556_v7  ;;  %v1013_v47 = vpack.c.bf16 %v577_v44, %v555_v6 }
 0x12b   : > { %1012 = vmatprep.subr.bf16.mxu0 %v1011_v46 }
 0x12c   : > { %1014 = vmatpush1.bf16.msra.mxu0 %v1013_v47 }
 0x12d   : > { %616 = vmatprep.subr.mxu0 %v1349_v54 }
 0x130   : > { %617 = vmatpush1.msra.mxu0 %v1349_v54 }
 0x131   : > { %977 = vmatmul.mubr.msk.f32.vlgmr.msra.gmra.mrb[0].mxu0 %vm581_vm12, %v579_v55 }
 0x132   : > { %658 = vmatprep.mubr.f32.mxu0 %v1347_v2 }
 0x135   : > { %978 = vmatmul.mubr.msk.f32.gmra.mrb[2].mxu0 %vm581_vm12, %v580_v58 }
 0x204   : > { %v654_v59 = vpop.f32.mrb[0].mxu0 }
 0x205   : > { %665 = vrot.lane.b32.xlu0 %v654_v59, %s1342_s7  ;;  %v656_v60 = vpop.f32.mrb[1].mxu0 }
 0x206   : > { %667 = vrot.lane.b32.xlu1 %v656_v60, %s1342_s7  ;;  %s2052_s7 = smov 112  }
 0x208   : > { %v1853_v61 = vpop.f32.mrb[2].mxu0 }
 0x209   : > { %673 = vrot.lane.b32.xlu0 %v654_v59, %s1343_s8  ;;  %v1856_v62 = vpop.f32.mrb[3].mxu0 }
 0x20a   : > { %675 = vrot.lane.b32.xlu1 %v656_v60, %s1343_s8  ;;  %s2053_s8 = smov 96  }
 0x20d   : > { %681 = vrot.lane.b32.xlu0 %v654_v59, %s1344_s29 }
 0x20e   : > { %683 = vrot.lane.b32.xlu1 %v656_v60, %s1344_s29 }
 0x211   : > { %691 = vrot.lane.b32.xlu0 %v654_v59, %s1345_s9 }
 0x212   : > { %693 = vrot.lane.b32.xlu1 %v656_v60, %s1345_s9  ;;  %s986_s9 = sshll.u32 %s1402_s22, 8  ;;  %s1350_s22 = smov [#allocation10]  }
 0x213   : > { %s1980_s16 = scalar_lea.hbm %s2027_s5, %s986_s9  ;;  %s1256_s6 = sshll.u32 %s1350_s22, 4  ;;  %s1257_s6 = int_to_ptr.vmem [resolvable:$false] %s1256_s6 }
 0x214   : > { %s1258_s17 = scalar_lea.vmem %s1257_s6, 512 }
 0x215   : > { %699 = vrot.lane.b32.xlu0 %v654_v59, %s1346_s10 }
 0x216   : > { %701 = vrot.lane.b32.xlu1 %v656_v60, %s1346_s10 }
 0x219   : > { %707 = vrot.lane.b32.xlu0 %v654_v59, %s1348_s12 }
 0x21a   : > { %709 = vrot.lane.b32.xlu1 %v656_v60, %s1348_s12 }
 0x21d   : > { %715 = vrot.lane.b32.xlu0 %v1853_v61, %s1337_s24 }
 0x21e   : > { %717 = vrot.lane.b32.xlu1 %v1856_v62, %s1337_s24  ;;  %s2054_s24 = smov 80  }
 0x221   : > { %723 = vrot.lane.b32.xlu0 %v1853_v61, %s1336_s26 }
 0x222   : > { %725 = vrot.lane.b32.xlu1 %v1856_v62, %s1336_s26  ;;  %s2055_s26 = sshll.u32 %s1571_s15, 4 }
 0x225   : > { %731 = vrot.lane.b32.xlu0 %v1853_v61, %s1338_s11 }
 0x226   : > { %733 = vrot.lane.b32.xlu1 %v1856_v62, %s1338_s11  ;;  %s282_s11 = scalar_lea.vmem [#allocation10], %s2055_s26 }
 0x227   : > { %s857_s29 = sshll.u32 %s282_s11, 4  ;;  %s1975_s29 = int_to_ptr.vmem [resolvable:$true] %s857_s29 }
 0x228   : > { %s1252_s13 = scalar_lea.vmem %s1975_s29, 256  ;;  %p1259_p12 = scmp.lt.s32.totalorder %s1975_s29, %s1257_s6 }
 0x229   : > { %741 = vrot.lane.b32.xlu0 %v1853_v61, %s2052_s7  ;;  %p1253_p10 = scmp.ne.s32.totalorder %s1975_s29, %s1252_s13  ;;  %p1260_p2 = scmp.lt.s32.totalorder %s1258_s17, %s1252_s13 }
 0x22a   : > { %743 = vrot.lane.b32.xlu1 %v1856_v62, %s2052_s7 }
 0x22b   : > { %p1254_p3 = pnand %p1253_p10, %p1526_p5  ;;  %p1261_p1 = por %p1260_p2, %p1259_p12 }
 0x22d   : > { %749 = vrot.lane.b32.xlu0 %v1853_v61, %s2053_s8  ;;  %p1255_p7 = pneg %p1254_p3 }
 0x22e   : > { %751 = vrot.lane.b32.xlu1 %v1856_v62, %s2053_s8 }
 0x22f   : > { %p1262_p4 = pnand %p1261_p1, %p1255_p7 }
 0x231   : > { %757 = vrot.lane.b32.xlu0 %v1853_v61, %s2054_s24 }
 0x232   : > { %759 = vrot.lane.b32.xlu1 %v1856_v62, %s2054_s24 }
 0x277   : > { %v666_v2 = vpop.permute.xlu0 %665 }
 0x278   : > { %v668_v63 = vpop.permute.xlu1 %667 }
 0x279   : > { %v669_v3 = vsel %vm437_vm6, %v666_v2, %v668_v63  ;;  %v670_v4 = vsel %vm437_vm6, %v668_v63, %v666_v2 }
 0x27a   : > { %v671_v24 = vmul.f32 %v670_v4, %v1736_v12  ;;  %v672_v26 = vmul.f32 %v669_v3, %v1739_v13  ;;  %v689_v13 = vmul.f32 %v654_v59, %v1788_v53 }
 0x27b   : > { %v674_v8 = vpop.permute.xlu0 %673 }
 0x27c   : > { %v676_v9 = vpop.permute.xlu1 %675 }
 0x27d   : > { %v677_v18 = vsel %vm458_vm7, %v674_v8, %v676_v9  ;;  %v678_v19 = vsel %vm458_vm7, %v676_v9, %v674_v8 }
 0x27e   : > { %v679_v25 = vmul.f32 %v678_v19, %v1761_v38  ;;  %v680_v0 = vmul.f32 %v677_v18, %v1767_v40  ;;  %v690_v38 = vmul.f32 %v656_v60, %v1785_v52 }
 0x27f   : > { %v682_v1 = vpop.permute.xlu0 %681 }
 0x280   : > { %v684_v27 = vpop.permute.xlu1 %683  ;;  %v1015_v28 = vpack.c.bf16 %v680_v0, %v672_v26  ;;  %v1017_v29 = vpack.c.bf16 %v679_v25, %v671_v24 }
 0x281   : > { %v685_v34 = vsel %vm480_vm8, %v682_v1, %v684_v27  ;;  %v686_v35 = vsel %vm480_vm8, %v684_v27, %v682_v1 }
 0x282   : > { %v687_v36 = vmul.f32 %v686_v35, %v1771_v41  ;;  %v688_v12 = vmul.f32 %v685_v34, %v1774_v42  ;;  %1016 = vmatprep.subr.bf16.mxu1 %v1015_v28 }
 0x283   : > { %v692_v40 = vpop.permute.xlu0 %691  ;;  %1018 = vmatpush1.bf16.msra.mxu1 %v1017_v29 }
 0x284   : > { %v694_v37 = vpop.permute.xlu1 %693  ;;  %v1019_v39 = vpack.c.bf16 %v690_v38, %v688_v12  ;;  %v1021_v43 = vpack.c.bf16 %v689_v13, %v687_v36 }
 0x285   : > { %v695_v6 = vsel %vm517_vm9, %v692_v40, %v694_v37  ;;  %v696_v7 = vsel %vm517_vm9, %v694_v37, %v692_v40 }
 0x286   : > { %1020 = vmatprep.subr.bf16.mxu1 %v1019_v39  ;;  %v697_v44 = vmul.f32 %v695_v6, %v1795_v56  ;;  %v698_v45 = vmul.f32 %v696_v7, %v1798_v57 }
 0x287   : > { %v700_v41 = vpop.permute.xlu0 %699  ;;  %1022 = vmatpush1.bf16.msra.mxu1 %v1021_v43 }
 0x288   : > { %v702_v42 = vpop.permute.xlu1 %701 }
 0x289   : > { %v703_v52 = vsel %vm539_vm10, %v700_v41, %v702_v42  ;;  %v704_v53 = vsel %vm539_vm10, %v702_v42, %v700_v41 }
 0x28a   : > { %v705_v46 = vmul.f32 %v703_v52, %v1822_v30  ;;  %v706_v47 = vmul.f32 %v704_v53, %v1825_v31 }
 0x28b   : > { %v708_v55 = vpop.permute.xlu0 %707 }
 0x28c   : > { %v710_v58 = vpop.permute.xlu1 %709  ;;  %v1023_v59 = vpack.c.bf16 %v706_v47, %v698_v45  ;;  %v1025_v60 = vpack.c.bf16 %v705_v46, %v697_v44  ;;  %v765_v44 = vld [vmem:[#allocation7] sm:$0xff] }
 0x28d   : > { %v711_v2 = vsel %vm561_vm11, %v708_v55, %v710_v58  ;;  %v712_v63 = vsel %vm561_vm11, %v710_v58, %v708_v55 }
 0x28e   : > { %1024 = vmatprep.subr.bf16.mxu1 %v1023_v59  ;;  %v713_v31 = vmul.f32 %v711_v2, %v1829_v32  ;;  %v714_v4 = vmul.f32 %v712_v63, %v1832_v33 }
 0x28f   : > { %1026 = vmatpush1.bf16.msra.mxu1 %v1025_v60  ;;  %v716_v3 = vpop.permute.xlu0 %715 }
 0x290   : > { %v718_v56 = vpop.permute.xlu1 %717 }
 0x291   : > { %v719_v57 = vsel %vm291_vm1, %v716_v3, %v718_v56  ;;  %v720_v30 = vsel %vm291_vm1, %v718_v56, %v716_v3 }
 0x292   : > { %v721_v8 = vmul.f32 %v720_v30, %v1655_v15  ;;  %v722_v9 = vmul.f32 %v719_v57, %v1658_v16 }
 0x293   : > { %v724_v18 = vpop.permute.xlu0 %723 }
 0x294   : > { %v726_v19 = vpop.permute.xlu1 %725  ;;  %v1027_v24 = vpack.c.bf16 %v722_v9, %v714_v4  ;;  %v1029_v25 = vpack.c.bf16 %v721_v8, %v713_v31 }
 0x295   : > { %v727_v26 = vsel %vm312_vm0, %v724_v18, %v726_v19  ;;  %v728_v0 = vsel %vm312_vm0, %v726_v19, %v724_v18 }
 0x296   : > { %1028 = vmatprep.subr.bf16.mxu1 %v1027_v24  ;;  %v729_v16 = vmul.f32 %v728_v0, %v1652_v14  ;;  %v730_v27 = vmul.f32 %v727_v26, %v1661_v17  ;;  %v740_v17 = vmul.f32 %v1856_v62, %v1671_v22 }
 0x297   : > { %v732_v1 = vpop.permute.xlu0 %731  ;;  %1030 = vmatpush1.bf16.msra.mxu1 %v1029_v25 }
 0x298   : > { %v734_v32 = vpop.permute.xlu1 %733 }
 0x299   : > { %v735_v33 = vsel %vm334_vm2, %v732_v1, %v734_v32  ;;  %v736_v15 = vsel %vm334_vm2, %v734_v32, %v732_v1 }
 0x29a   : > { %v737_v28 = vmul.f32 %v736_v15, %v1665_v20  ;;  %v738_v29 = vmul.f32 %v735_v33, %v1668_v21  ;;  %v739_v20 = vmul.f32 %v1853_v61, %v1674_v23 }
 0x29b   : > { %v742_v34 = vpop.permute.xlu0 %741 }
 0x29c   : > { %v744_v35 = vpop.permute.xlu1 %743  ;;  %v1031_v36 = vpack.c.bf16 %v738_v29, %v730_v27  ;;  %v1033_v12 = vpack.c.bf16 %v737_v28, %v729_v16 }
 0x29d   : > { %v745_v38 = vsel %vm371_vm3, %v742_v34, %v744_v35  ;;  %v746_v13 = vsel %vm371_vm3, %v744_v35, %v742_v34 }
 0x29e   : > { %v747_v40 = vmul.f32 %v745_v38, %v1700_v48  ;;  %v748_v14 = vmul.f32 %v746_v13, %v1703_v49  ;;  %1032 = vmatprep.subr.bf16.mxu1 %v1031_v36 }
 0x29f   : > { %v750_v21 = vpop.permute.xlu0 %749  ;;  %1034 = vmatpush1.bf16.msra.mxu1 %v1033_v12 }
 0x2a0   : > { %v752_v37 = vpop.permute.xlu1 %751  ;;  %v1035_v39 = vpack.c.bf16 %v748_v14, %v740_v17  ;;  %v1037_v43 = vpack.c.bf16 %v747_v40, %v739_v20 }
 0x2a1   : > { %v753_v6 = vsel %vm393_vm4, %v750_v21, %v752_v37  ;;  %v754_v48 = vsel %vm393_vm4, %v752_v37, %v750_v21 }
 0x2a2   : > { %1036 = vmatprep.subr.bf16.mxu1 %v1035_v39  ;;  %v755_v61 = vmul.f32 %v753_v6, %v1707_v50  ;;  %v756_v62 = vmul.f32 %v754_v48, %v1710_v51 }
 0x2a3   : > { %v758_v49 = vpop.permute.xlu0 %757  ;;  %1038 = vmatpush1.bf16.msra.mxu1 %v1037_v43 }
 0x2a4   : > { %v760_v7 = vpop.permute.xlu1 %759 }
 0x2a5   : > { %v761_v22 = vsel %vm415_vm5, %v758_v49, %v760_v7  ;;  %v762_v23 = vsel %vm415_vm5, %v760_v7, %v758_v49 }
 0x2a6   : > { %v763_v41 = vmul.f32 %v761_v22, %v1729_v10  ;;  %v764_v42 = vmul.f32 %v762_v23, %v1732_v11 }
 0x2a8   : > { %v1039_v52 = vpack.c.bf16 %v764_v42, %v756_v62  ;;  %v1041_v53 = vpack.c.bf16 %v763_v41, %v755_v61 }
 0x2aa   : > { %1040 = vmatprep.subr.bf16.mxu1 %v1039_v52 }
 0x2ab   : > { %1042 = vmatpush1.bf16.msra.mxu1 %v1041_v53 }
 0x2ac   : > { %797 = vmatprep.subr.mxu1 %v1349_v54 }
 0x2af   : > { %798 = vmatpush1.msra.mxu1 %v1349_v54 }
 0x2b0   : > { %979 = vmatmul.mubr.msk.f32.vlgmr.msra.gmra.mrb[0].mxu1 %vm581_vm12, %v765_v44 }
 0x383   : > { %v835_v5 = vpop.f32.mrb[0].mxu1 }
 0x384   : > { %840 = vst [vmem:[%s282_s11] sm:$0xff] %v835_v5  ;;  %v837_v50 = vpop.f32.mrb[1].mxu1 }
 0x385   : > { %841 = vst [vmem:[%s282_s11 + $0x8] sm:$0xff] %v837_v50 }
 0x386   : > { %1265 = shalt.err (!%p1262_p4)
}
 0x387   : > { %s1266_s15 = scalar_lea.hbm %s1980_s16, 256  ;;  %s1270_s8 = scalar_lea.hbm %s2027_s5, 512 }
 0x388   : > { %p1267_p0 = scmp.ne.s32.totalorder %s1980_s16, %s1266_s15  ;;  %p1271_p8 = scmp.lt.u32.totalorder %s1980_s16, %s2027_s5 }
 0x389   : > { %p1272_p13 = scmp.lt.u32.totalorder %s1270_s8, %s1266_s15  ;;  %p1274_p10 = scmp.lt.u32.totalorder %s1266_s15, %s1980_s16 }
 0x38a   : > { %p1268_p9 = pnand %p1267_p0, %p1526_p5 }
 0x38b   : > { %p1273_p6 = por %p1272_p13, %p1271_p8 }
 0x38c   : > { %p1269_p11 = pneg %p1268_p9 }
 0x38d   : > { %p1275_p3 = por %p1274_p10, %p1273_p6 }
 0x38f   : > { %p1276_p7 = pnand %p1275_p3, %p1269_p11 }
 0x391   : > { %1279 = shalt.err (!%p1276_p7)
}
 0x392   : > { %1057 = dma.vmem_to_hbm [thread:$0]  (%p1526_p5), %s1975_s29, 256, %s1980_s16, %s843_s14  }
 0x393 PF: > { %s869_s11 = sand.u32 1, %s1314_s18   ;;  %p2056_p12 = scmp.ne.s32.totalorder %s2039_s25, 0 }
 0x394   : > { %p2057_p2 = scmp.ge.s32.totalorder %s1326_s21, 2  ;;  %s870_s9 = scalar_lea.sflag [#allocation4], %s869_s11 }
 0x396   : > { %p1074_p1 = pnand %p2057_p2, %p2056_p12 }
 0x398   : > { %1309 = dma.done.wait (!%p1074_p1), %s870_s9, 256  }
 0x399   : > { %1311 = vsyncadd (!%p1074_p1), %s870_s9, 4294967040  ;;  %p20_p4 = scmp.ge.s32.totalorder %s1512_s28, 4   ;;  %s2058_s18 = smov %s1318_s19 }
 0x39a   : > { %s2059_s19 = smov %s1322_s20  ;;  %s2060_s20 = smov %s1522_s27 }
 0x39b   : > { %s2061_s21 = smov %s1512_s28  ;;  %22 = sbr.rel (!%p20_p4) target bundleno = 7 (0x7), region = 109 }
 0x3a2   :  { %875 = vsyncpa [#allocation3], 1 }
 0x3a3   :  { %877 = vsyncpa [#allocation3 + $0x1], 1 }
 0x3a4   :  { %878 = vsyncpa [#allocation6], 1 }
 0x3a5   :  { %879 = vsyncpa [#allocation9], 1 }
 0x3a6   :  { %880 = vsyncpa [#allocation4], 1 }
 0x3a7   :  { %882 = vsyncpa [#allocation4 + $0x1], 1 }

</bundles_post_ra>
